<compile_context>
chip_gen: v7x
topology: tpu7x:2x2x1
jax: 0.10.0
libtpu: 0.0.40
codegen_flags: <defaults>
</compile_context>

<pallas_src>
import math

import jax
import jax.numpy as jnp
from jax.experimental import pallas as pl
from jax.experimental.pallas import tpu as pltpu


# --------------------------- helpers ------------------------------------------------
def _vmem_limit_bytes():
    """~75% of this generation's physical VMEM, capped; safe fallback if query fails."""
    try:
        cap = int(getattr(pltpu.get_tpu_info(), "vmem_capacity_bytes", 64 * 1024 * 1024))
    except Exception:  # pragma: no cover - conservative fallback
        cap = 64 * 1024 * 1024
    return max(32 * 1024 * 1024, min((cap * 3) // 4, 96 * 1024 * 1024))


def _pick_tile(dim, preferred, granularity):
    """Largest multiple of `granularity` <= preferred that divides dim; else full dim."""
    if dim <= preferred:
        return dim
    t = (preferred // granularity) * granularity
    while t >= granularity:
        if dim % t == 0:
            return t
        t -= granularity
    return dim  # full-dim block is always legal (may be large; see TODO above)


# ----------------- Kernel 1: fused gate/up GEMM (full-K) + SwiGLU -------------------
def _gate_up_silu_kernel(x_ref, wgu_ref, o_ref):
    # x_ref: (tm, H), wgu_ref: (H, 2*tn) packed as [gate_j | up_j], o_ref: (tm, tn)
    tn = o_ref.shape[-1]
    gu = jnp.dot(x_ref[...], wgu_ref[...], preferred_element_type=jnp.float32)
    g = gu[:, :tn]
    u = gu[:, tn:]
    o_ref[...] = ((g * jax.nn.sigmoid(g)) * u).astype(o_ref.dtype)  # SiLU(gate) * up


def fused_gate_up_silu(x, wgu, *, tm, tn, out_dtype):
    """x: (T, H); wgu: (H, 2*I) with tn-block interleaved [gate_j | up_j] columns."""
    T, H = x.shape
    I = wgu.shape[1] // 2
    assert T % tm == 0 and I % tn == 0, "dims must divide tiles"

    grid = (T // tm, I // tn)
    bpe = jnp.dtype(x.dtype).itemsize
    flops = 2 * T * H * 2 * I
    bytes_accessed = (T * H + H * 2 * I) * bpe + T * I * jnp.dtype(out_dtype).itemsize

    return pl.pallas_call(
        _gate_up_silu_kernel,
        out_shape=jax.ShapeDtypeStruct((T, I), out_dtype),
        grid_spec=pltpu.PrefetchScalarGridSpec(
            num_scalar_prefetch=0,
            grid=grid,
            in_specs=[
                # x block index is constant across j -> read once per row block.
                pl.BlockSpec((tm, H), lambda i, j: (i, 0)),
                pl.BlockSpec((H, 2 * tn), lambda i, j: (0, j)),
            ],
            out_specs=pl.BlockSpec((tm, tn), lambda i, j: (i, j)),
        ),
        compiler_params=pltpu.CompilerParams(
            dimension_semantics=("parallel", "parallel"),
            vmem_limit_bytes=_vmem_limit_bytes(),
        ),
        cost_estimate=pl.CostEstimate(
            flops=int(flops), transcendentals=int(T * I), bytes_accessed=int(bytes_accessed)
        ),
    )(x, wgu)


# --------------------- Kernel 2: tiled down projection ------------------------------
def _down_proj_kernel(a_ref, b_ref, o_ref, acc_ref):
    k = pl.program_id(2)

    @pl.when(k == 0)
    def _():
        acc_ref[...] = jnp.zeros_like(acc_ref)

    acc_ref[...] += jnp.dot(a_ref[...], b_ref[...], preferred_element_type=jnp.float32)

    @pl.when(k == pl.num_programs(2) - 1)
    def _():
        o_ref[...] = acc_ref[...].astype(o_ref.dtype)


def tiled_matmul(a, b, *, tm, tn, tk, out_dtype):
    """a: (T, K); b: (K, N)."""
    T, K = a.shape
    N = b.shape[1]
    assert T % tm == 0 and N % tn == 0 and K % tk == 0, "dims must divide tiles"

    grid = (T // tm, N // tn, K // tk)
    bytes_accessed = (
        T * K * jnp.dtype(a.dtype).itemsize
        + K * N * jnp.dtype(b.dtype).itemsize
        + T * N * jnp.dtype(out_dtype).itemsize
    )

    return pl.pallas_call(
        _down_proj_kernel,
        out_shape=jax.ShapeDtypeStruct((T, N), out_dtype),
        grid_spec=pltpu.PrefetchScalarGridSpec(
            num_scalar_prefetch=0,
            grid=grid,
            in_specs=[
                pl.BlockSpec((tm, tk), lambda i, j, k: (i, k)),
                pl.BlockSpec((tk, tn), lambda i, j, k: (k, j)),
            ],
            out_specs=pl.BlockSpec((tm, tn), lambda i, j, k: (i, j)),
            scratch_shapes=[pltpu.VMEM((tm, tn), jnp.float32)],
        ),
        compiler_params=pltpu.CompilerParams(
            dimension_semantics=("parallel", "parallel", "arbitrary"),
            vmem_limit_bytes=_vmem_limit_bytes(),
        ),
        cost_estimate=pl.CostEstimate(
            flops=int(2 * T * K * N), transcendentals=0, bytes_accessed=int(bytes_accessed)
        ),
    )(a, b)


# --------------------- weight prep (done once, not per forward) ---------------------
def prepare_qwen2_mlp_weights(w_gate, w_up, w_down, *, tn, dtype=jnp.bfloat16):
    """torch nn.Linear layout in: w_gate/w_up (I, H), w_down (H, I).

    Returns:
      wgu: (H, 2*I) bf16, column blocks of width 2*tn arranged [gate_j | up_j].
      wd:  (I, H) bf16 (transposed down_proj weight).
    """
    I, H = w_gate.shape
    assert I % tn == 0
    wg = jnp.transpose(w_gate).astype(dtype)  # (H, I)
    wu = jnp.transpose(w_up).astype(dtype)    # (H, I)
    nblk = I // tn
    wgu = jnp.concatenate(
        [wg.reshape(H, nblk, tn), wu.reshape(H, nblk, tn)], axis=2
    ).reshape(H, 2 * I)
    wd = jnp.transpose(w_down).astype(dtype)  # (I, H)
    return wgu, wd


# --------------------- Qwen2MLP forward factory --------------------------------------
def make_qwen2_mlp(w_gate, w_up, w_down, *, compute_dtype=jnp.bfloat16,
                   tm_pref=512, tn_pref=512, tk_down_pref=2048):
    """Builds a jitted forward(x) closure over pre-transposed/packed bf16 weights."""
    I, H = w_gate.shape
    assert w_up.shape == (I, H) and w_down.shape == (H, I)

    bpe = jnp.dtype(compute_dtype).itemsize
    limit = _vmem_limit_bytes()

    tn = _pick_tile(I, tn_pref, 128)
    tm_budget = tm_pref

    # Keep the full-K gate/up working set (double-buffered tiles + f32 epilogue temps)
    # within the per-generation VMEM budget.
    def _ws(tm_, tn_):
        return 2 * bpe * (tm_ * H + H * 2 * tn_ + tm_ * tn_) + 16 * tm_ * tn_

    while _ws(tm_budget, tn) > limit and tm_budget > 64:
        tm_budget //= 2
    while (_ws(tm_budget, tn) > limit and tn > 256
           and (tn // 2) % 128 == 0 and I % (tn // 2) == 0):
        tn //= 2

    wgu, wd = prepare_qwen2_mlp_weights(w_gate, w_up, w_down, tn=tn, dtype=compute_dtype)

    tn_down = _pick_tile(H, tn_pref, 128)
    tk_down = _pick_tile(I, tk_down_pref, 128)

    def forward(x):
        orig_shape = x.shape
        orig_dtype = x.dtype
        assert orig_shape[-1] == H
        T = math.prod(orig_shape[:-1])
        tm = _pick_tile(T, tm_budget, 8)

        x2 = x.reshape(T, H).astype(compute_dtype)
        h = fused_gate_up_silu(x2, wgu, tm=tm, tn=tn, out_dtype=compute_dtype)
        out = tiled_matmul(h, wd, tm=tm, tn=tn_down, tk=tk_down, out_dtype=orig_dtype)
        return out.reshape(orig_shape)

    return jax.jit(forward)


# --------------------- pure-JAX reference -------------------------------------------
def reference_mlp(x, w_gate, w_up, w_down):
    g = jnp.einsum("...h,ih->...i", x, w_gate)
    u = jnp.einsum("...h,ih->...i", x, w_up)
    h = (g * jax.nn.sigmoid(g)) * u
    return jnp.einsum("...i,hi->...h", h, w_down)


if __name__ == "__main__":
    # Small shapes consistent with the module, lane-dense on the last dims.
    B, S, HIDDEN, INTERMEDIATE = 2, 8, 128, 256

    key = jax.random.PRNGKey(0)
    kx, kg, ku, kd = jax.random.split(key, 4)
    x = jax.random.normal(kx, (B, S, HIDDEN), jnp.float32)
    w_gate = jax.random.normal(kg, (INTERMEDIATE, HIDDEN), jnp.float32) * 0.05
    w_up = jax.random.normal(ku, (INTERMEDIATE, HIDDEN), jnp.float32) * 0.05
    w_down = jax.random.normal(kd, (HIDDEN, INTERMEDIATE), jnp.float32) * 0.05

    mlp = make_qwen2_mlp(w_gate, w_up, w_down)
    out = mlp(x)
    jax.block_until_ready(out)

    ref = reference_mlp(x, w_gate, w_up, w_down)

    assert out.shape == x.shape
    assert bool(jnp.all(jnp.isfinite(out)))
    assert bool(jnp.allclose(out, ref, atol=5e-2, rtol=5e-2)), "mismatch vs reference"
    print("KERNEL_OK")
</pallas_src>

<mosaic_0001>
module attributes {stable_mosaic.version = 11 : i64} {
  func.func @_gate_up_silu_kernel(%arg0: i32, %arg1: i32, %arg2: memref<16x128xbf16, #tpu.memory_space<vmem>>, %arg3: memref<128x512xbf16, #tpu.memory_space<vmem>>, %arg4: memref<16x256xbf16, #tpu.memory_space<vmem>>) attributes {dimension_semantics = [#tpu.dimension_semantics<parallel>, #tpu.dimension_semantics<parallel>], iteration_bounds = array<i64: 1, 1>, scalar_prefetch = 0 : i64, scratch_operands = 0 : i64, tpu.core_type = #tpu.core_type<tc>, window_params = [{transform_indices = @transform_0, window_bounds = array<i64: 16, 128>}, {transform_indices = @transform_1, window_bounds = array<i64: 128, 512>}, {transform_indices = @transform_2, window_bounds = array<i64: 16, 256>}]} {
    %c0 = arith.constant 0 : index
    %c0_0 = arith.constant 0 : index
    %0 = vector.load %arg2[%c0, %c0_0] : memref<16x128xbf16, #tpu.memory_space<vmem>>, vector<16x128xbf16>
    %c0_1 = arith.constant 0 : index
    %c0_2 = arith.constant 0 : index
    %1 = vector.load %arg3[%c0_1, %c0_2] : memref<128x512xbf16, #tpu.memory_space<vmem>>, vector<128x512xbf16>
    %cst = arith.constant dense<0.000000e+00> : vector<16x512xf32>
    %2 = tpu.matmul %0, %1, %cst {dimension_numbers = #tpu.dot_dimension_numbers<[1], [0], [0], [1], [0, 0, 1, 1], [], []>} : vector<16x128xbf16>, vector<128x512xbf16>, vector<16x512xf32> -> vector<16x512xf32>
    %3 = vector.extract_strided_slice %2 {offsets = [0, 0], sizes = [16, 256], strides = [1, 1]} : vector<16x512xf32> to vector<16x256xf32>
    %4 = vector.extract_strided_slice %2 {offsets = [0, 256], sizes = [16, 256], strides = [1, 1]} : vector<16x512xf32> to vector<16x256xf32>
    %5 = arith.negf %3 : vector<16x256xf32>
    %6 = math.exp %5 : vector<16x256xf32>
    %cst_3 = arith.constant 1.000000e+00 : f32
    %7 = vector.broadcast %cst_3 : f32 to vector<16x256xf32>
    %8 = arith.addf %7, %6 : vector<16x256xf32>
    %9 = arith.divf %7, %8 : vector<16x256xf32>
    %10 = arith.mulf %3, %9 : vector<16x256xf32>
    %11 = arith.mulf %10, %4 : vector<16x256xf32>
    %12 = arith.truncf %11 : vector<16x256xf32> to vector<16x256xbf16>
    %c0_4 = arith.constant 0 : index
    %c0_5 = arith.constant 0 : index
    %13 = vector.load %arg4[%c0_4, %c0_5] : memref<16x256xbf16, #tpu.memory_space<vmem>>, vector<16x256xbf16>
    tpu.vector_store %arg4[%c0_4, %c0_5], %12 {strides = array<i32>} : memref<16x256xbf16, #tpu.memory_space<vmem>>, vector<16x256xbf16>,
    return
  }
  func.func @transform_0(%arg0: i32, %arg1: i32) -> (i32, i32) {
    %c0_i32 = arith.constant 0 : i32
    %c0_i32_0 = arith.constant 0 : i32
    return %arg0, %c0_i32 : i32, i32
  }
  func.func @transform_1(%arg0: i32, %arg1: i32) -> (i32, i32) {
    %c0_i32 = arith.constant 0 : i32
    %c0_i32_0 = arith.constant 0 : i32
    return %c0_i32, %arg1 : i32, i32
  }
  func.func @transform_2(%arg0: i32, %arg1: i32) -> (i32, i32) {
    %c0_i32 = arith.constant 0 : i32
    return %arg0, %arg1 : i32, i32
  }
}

module attributes {stable_mosaic.version = 11 : i64} {
  func.func @_down_proj_kernel(%arg0: i32, %arg1: i32, %arg2: i32, %arg3: memref<16x256xbf16, #tpu.memory_space<vmem>>, %arg4: memref<256x128xbf16, #tpu.memory_space<vmem>>, %arg5: memref<16x128xf32, #tpu.memory_space<vmem>>, %arg6: memref<16x128xf32, #tpu.memory_space<vmem>>) attributes {dimension_semantics = [#tpu.dimension_semantics<parallel>, #tpu.dimension_semantics<parallel>, #tpu.dimension_semantics<arbitrary>], iteration_bounds = array<i64: 1, 1, 1>, scalar_prefetch = 0 : i64, scratch_operands = 1 : i64, tpu.core_type = #tpu.core_type<tc>, window_params = [{transform_indices = @transform_0, window_bounds = array<i64: 16, 256>}, {transform_indices = @transform_1, window_bounds = array<i64: 256, 128>}, {transform_indices = @transform_2, window_bounds = array<i64: 16, 128>}]} {
    %c0_i32 = arith.constant 0 : i32
    %0 = arith.cmpi eq, %arg2, %c0_i32 : i32
    %1 = arith.extui %0 : i1 to i32
    %c0_i32_0 = arith.constant 0 : i32
    %2 = arith.cmpi ne, %1, %c0_i32_0 : i32
    scf.if %2 {
      %cst_10 = arith.constant 0.000000e+00 : f32
      %12 = vector.broadcast %cst_10 : f32 to vector<16x128xf32>
      %c0_11 = arith.constant 0 : index
      %c0_12 = arith.constant 0 : index
      %13 = vector.load %arg6[%c0_11, %c0_12] : memref<16x128xf32, #tpu.memory_space<vmem>>, vector<16x128xf32>
      tpu.vector_store %arg6[%c0_11, %c0_12], %12 {strides = array<i32>} : memref<16x128xf32, #tpu.memory_space<vmem>>, vector<16x128xf32>,
    } else {
    }
    %c0 = arith.constant 0 : index
    %c0_1 = arith.constant 0 : index
    %3 = vector.load %arg6[%c0, %c0_1] : memref<16x128xf32, #tpu.memory_space<vmem>>, vector<16x128xf32>
    %c0_2 = arith.constant 0 : index
    %c0_3 = arith.constant 0 : index
    %4 = vector.load %arg3[%c0_2, %c0_3] : memref<16x256xbf16, #tpu.memory_space<vmem>>, vector<16x256xbf16>
    %c0_4 = arith.constant 0 : index
    %c0_5 = arith.constant 0 : index
    %5 = vector.load %arg4[%c0_4, %c0_5] : memref<256x128xbf16, #tpu.memory_space<vmem>>, vector<256x128xbf16>
    %cst = arith.constant dense<0.000000e+00> : vector<16x128xf32>
    %6 = tpu.matmul %4, %5, %cst {dimension_numbers = #tpu.dot_dimension_numbers<[1], [0], [0], [1], [0, 0, 1, 1], [], []>} : vector<16x256xbf16>, vector<256x128xbf16>, vector<16x128xf32> -> vector<16x128xf32>
    %7 = arith.addf %3, %6 : vector<16x128xf32>
    %c0_6 = arith.constant 0 : index
    %c0_7 = arith.constant 0 : index
    %8 = vector.load %arg6[%c0_6, %c0_7] : memref<16x128xf32, #tpu.memory_space<vmem>>, vector<16x128xf32>
    tpu.vector_store %arg6[%c0_6, %c0_7], %7 {strides = array<i32>} : memref<16x128xf32, #tpu.memory_space<vmem>>, vector<16x128xf32>,
    %c0_i32_8 = arith.constant 0 : i32
    %9 = arith.cmpi eq, %arg2, %c0_i32_8 : i32
    %10 = arith.extui %9 : i1 to i32
    %c0_i32_9 = arith.constant 0 : i32
    %11 = arith.cmpi ne, %10, %c0_i32_9 : i32
    scf.if %11 {
      %c0_10 = arith.constant 0 : index
      %c0_11 = arith.constant 0 : index
      %12 = vector.load %arg6[%c0_10, %c0_11] : memref<16x128xf32, #tpu.memory_space<vmem>>, vector<16x128xf32>
      %c0_12 = arith.constant 0 : index
      %c0_13 = arith.constant 0 : index
      %13 = vector.load %arg5[%c0_12, %c0_13] : memref<16x128xf32, #tpu.memory_space<vmem>>, vector<16x128xf32>
      tpu.vector_store %arg5[%c0_12, %c0_13], %12 {strides = array<i32>} : memref<16x128xf32, #tpu.memory_space<vmem>>, vector<16x128xf32>,
    } else {
    }
    return
  }
  func.func @transform_0(%arg0: i32, %arg1: i32, %arg2: i32) -> (i32, i32) {
    %c0_i32 = arith.constant 0 : i32
    return %arg0, %arg2 : i32, i32
  }
  func.func @transform_1(%arg0: i32, %arg1: i32, %arg2: i32) -> (i32, i32) {
    %c0_i32 = arith.constant 0 : i32
    return %arg2, %arg1 : i32, i32
  }
  func.func @transform_2(%arg0: i32, %arg1: i32, %arg2: i32) -> (i32, i32) {
    %c0_i32 = arith.constant 0 : i32
    return %arg0, %arg1 : i32, i32
  }
}

</mosaic_0001>

<bundles_post_ra>
// kernel: forward.3
= control target key start
LH: loop header
LB: loop body
LE: loop exit
PB: predicated region body
PF: predicated region fallthrough
CT: control target
= control target key end

     0   :  { %s399_s0 = inlined_call_operand.vmem [shape: bf16[16,256], index: 0, kind: input, shape index: {}]   ;;  %s400_s1 = inlined_call_operand.vmem [shape: bf16[256,128], index: 1, kind: input, shape index: {}]   ;;  %s401_s2 = inlined_call_operand.hbm [shape: f32[16,128], index: 2, kind: output, shape index: {}]  }
   0x1   :  { %v272_v0 = vld [vmem:[%s400_s1 + $0x40] sm:$0xff]   ;;  %v274_v2 = vld [vmem:[%s400_s1 + $0x48] sm:$0xff]   ;;  %v276_v4 = vld [vmem:[%s400_s1 + $0x50] sm:$0xff]  }
   0x2   :  { %v273_v1 = vld [vmem:[%s400_s1] sm:$0xff]   ;;  %247 = vmatprep.subr.bf16.mxu0 %v272_v0  ;;  %v275_v3 = vld [vmem:[%s400_s1 + $0x8] sm:$0xff]   ;;  %v277_v5 = vld [vmem:[%s400_s1 + $0x10] sm:$0xff]  }
   0x3   :  { %248 = vmatpush3.bf16.msra.mxu0 %v273_v1  ;;  %v278_v6 = vld [vmem:[%s400_s1 + $0x58] sm:$0xff]   ;;  %v280_v8 = vld [vmem:[%s400_s1 + $0x60] sm:$0xff]   ;;  %v282_v10 = vld [vmem:[%s400_s1 + $0x68] sm:$0xff]  }
   0x4   :  { %249 = vmatprep.subr.bf16.mxu0 %v274_v2  ;;  %v279_v7 = vld [vmem:[%s400_s1 + $0x18] sm:$0xff]   ;;  %v281_v9 = vld [vmem:[%s400_s1 + $0x20] sm:$0xff]  }
   0x5   :  { %v290_v11 = vld [vmem:[%s399_s0 + $0x4] ss:$8 sps:$4 sm:$0xff]  }
   0x7   :  { %250 = vmatpush3.bf16.msra.mxu0 %v275_v3 }
   0x8   :  { %251 = vmatprep.subr.bf16.mxu0 %v276_v4 }
   0xb   :  { %252 = vmatpush3.bf16.msra.mxu0 %v277_v5 }
   0xc   :  { %253 = vmatprep.subr.bf16.mxu0 %v278_v6 }
   0xf   :  { %254 = vmatpush3.bf16.msra.mxu0 %v279_v7 }
  0x10   :  { %255 = vmatprep.subr.bf16.mxu0 %v280_v8 }
  0x11   :  { %7 = vsyncpa [#allocation4], 0  ;;  %v283_v12 = vld [vmem:[%s400_s1 + $0x28] sm:$0xff]   ;;  %193 = vmatprep.mubr.bf16.mxu0 %v290_v11  ;;  %v284_v13 = vld [vmem:[%s400_s1 + $0x70] sm:$0xff]   ;;  %s315_s17 = smov [#allocation3]  }
  0x12   :  { %v285_v14 = vld [vmem:[%s400_s1 + $0x30] sm:$0xff]   ;;  %v286_v15 = vld [vmem:[%s400_s1 + $0x78] sm:$0xff]   ;;  %v288_v17 = vld [vmem:[%s399_s0] ss:$8 sps:$4 sm:$0xff]   ;;  %s218_s18 = sshll.u32 %s315_s17, 4  ;;  %s219_s18 = int_to_ptr.vmem [resolvable:$true] %s218_s18 }
  0x13   :  { %256 = vmatpush3.bf16.msra.mxu0 %v281_v9  ;;  %v287_v16 = vld [vmem:[%s400_s1 + $0x38] sm:$0xff]   ;;  %s291_s19 = scalar_lea.vmem %s219_s18, 256  ;;  %p296_p1 = scmp.lt.s32.totalorder %s219_s18, %s219_s18 }
  0x14   :  { %257 = vmatprep.subr.bf16.mxu0 %v282_v10  ;;  %p292_p0 = scmp.ne.s32.totalorder %s219_s18, %s291_s19  ;;  %p297_p2 = scmp.lt.s32.totalorder %s291_s19, %s291_s19 }
  0x16   :  { %p298_p3 = por %p297_p2, %p296_p1 }
  0x17   :  { %258 = vmatpush3.bf16.msra.mxu0 %v283_v12 }
  0x18   :  { %259 = vmatprep.subr.bf16.mxu0 %v284_v13  ;;  %p299_p4 = pnand %p298_p3, %p292_p0 }
  0x1b   :  { %260 = vmatpush3.bf16.msra.mxu0 %v285_v14 }
  0x1c   :  { %261 = vmatprep.subr.bf16.mxu0 %v286_v15 }
  0x1f   :  { %262 = vmatpush3.bf16.msra.mxu0 %v287_v16 }
  0x22   :  { %194 = vmatmul.mubr.bf16.vlgmr.msra.gmra.mrb[0].mxu0 %v288_v17 }
  0xf5   :  { %v263_v18 = vpop.f32.mrb[0].mxu0 }
  0xf6   :  { %v264_v19 = vpop.f32.mrb[1].mxu0 }
  0xf7   :  { %v265_v20 = vadd.f32 %v264_v19, %v263_v18  ;;  %v266_v21 = vpop.f32.mrb[2].mxu0 }
  0xf8   :  { %v267_v22 = vpop.f32.mrb[3].mxu0 }
  0xf9   :  { %211 = vst [vmem:[#allocation3] sm:$0xff] %v265_v20  ;;  %v268_v23 = vadd.f32 %v267_v22, %v266_v21 }
  0xfb   :  { %212 = vst [vmem:[#allocation3 + $0x8] sm:$0xff] %v268_v23 }
  0xfc   :  { %302 = shalt.err (!%p299_p4)
}
  0xfd   :  { %s303_s20 = scalar_lea.hbm %s401_s2, 256 }
  0xfe   :  { %p304_p5 = scmp.ne.s32.totalorder %s401_s2, %s303_s20  ;;  %p307_p6 = scmp.lt.u32.totalorder %s303_s20, %s401_s2 }
 0x100   :  { %p309_p7 = pnand %p307_p6, %p304_p5 }
 0x102   :  { %312 = shalt.err (!%p309_p7)
}
 0x103   :  { %s316_s25 = smov 128   ;;  %s317_s26 = smov 8  }
 0x104   :  { %224 = dma.vmem_to_hbm [thread:$0]  %s219_s18, 256, %s401_s2, [#allocation4], %s316_s25, %s316_s25, %s317_s26  }
 0x105   :  { %313 = dma.done.wait [#allocation4], 256  }
 0x106   :  { %314 = vsyncadd [#allocation4], 4294967040 }
 0x107   :  { %228 = vsyncpa [#allocation4], 1 }

// kernel: forward.2
= control target key start
LH: loop header
LB: loop body
LE: loop exit
PB: predicated region body
PF: predicated region fallthrough
CT: control target
= control target key end

     0   :  { %v455_v1 = vmov 0   ;;  %s576_s1 = inlined_call_operand.vmem [shape: bf16[128,512], index: 1, kind: input, shape index: {}]   ;;  %s577_s0 = inlined_call_operand.vmem [shape: bf16[16,128], index: 0, kind: input, shape index: {}]   ;;  %s578_s2 = inlined_call_operand.vmem [shape: bf16[16,256], index: 2, kind: output, shape index: {}]  }
   0x1   :  { %v390_v0 = vld [vmem:[%s576_s1 + $0x4] ss:$16 sps:$4 sm:$0xff]   ;;  %244 = vmatprep.mubr.bf16.mxu0 %v455_v1  ;;  %287 = vmatprep.mubr.bf16.mxu1 %v455_v1  ;;  %v392_v2 = vld [vmem:[%s576_s1] ss:$16 sps:$4 sm:$0xff]   ;;  %v411_v8 = vld [vmem:[%s576_s1 + $0xc] ss:$16 sps:$4 sm:$0xff]  }
   0x2   :  { %212 = vmatprep.subr.bf16.mxu0 %v390_v0  ;;  %v393_v3 = vld [vmem:[%s576_s1 + $0x24] ss:$16 sps:$4 sm:$0xff]   ;;  %v395_v4 = vld [vmem:[%s576_s1 + $0x20] ss:$16 sps:$4 sm:$0xff]   ;;  %v413_v9 = vld [vmem:[%s576_s1 + $0x8] ss:$16 sps:$4 sm:$0xff]   ;;  %255 = vmatprep.subr.bf16.mxu1 %v411_v8 }
   0x3   :  { %213 = vmatpush1.bf16.msra.mxu0 %v392_v2  ;;  %v396_v5 = vld [vmem:[%s576_s1 + $0x44] ss:$16 sps:$4 sm:$0xff]   ;;  %v398_v6 = vld [vmem:[%s576_s1 + $0x40] ss:$16 sps:$4 sm:$0xff]   ;;  %v417_v12 = vld [vmem:[%s576_s1 + $0x2c] ss:$16 sps:$4 sm:$0xff]   ;;  %256 = vmatpush1.bf16.msra.mxu1 %v413_v9 }
   0x4   :  { %214 = vmatprep.subr.bf16.mxu0 %v393_v3  ;;  %v399_v7 = vld [vmem:[%s576_s1 + $0x64] ss:$16 sps:$4 sm:$0xff]   ;;  %v401_v10 = vld [vmem:[%s576_s1 + $0x60] ss:$16 sps:$4 sm:$0xff]   ;;  %v419_v13 = vld [vmem:[%s576_s1 + $0x28] ss:$16 sps:$4 sm:$0xff]   ;;  %257 = vmatprep.subr.bf16.mxu1 %v417_v12 }
   0x5   :  { %v402_v11 = vld [vmem:[%s576_s1 + $0x84] ss:$16 sps:$4 sm:$0xff]   ;;  %v404_v14 = vld [vmem:[%s576_s1 + $0x80] ss:$16 sps:$4 sm:$0xff]   ;;  %v421_v15 = vld [vmem:[%s576_s1 + $0x4c] ss:$16 sps:$4 sm:$0xff]  }
   0x6   :  { %v405_v16 = vld [vmem:[%s576_s1 + $0xa4] ss:$16 sps:$4 sm:$0xff]   ;;  %v423_v17 = vld [vmem:[%s576_s1 + $0x48] ss:$16 sps:$4 sm:$0xff]   ;;  %v424_v18 = vld [vmem:[%s576_s1 + $0x6c] ss:$16 sps:$4 sm:$0xff]  }
   0x7   :  { %215 = vmatpush1.bf16.msra.mxu0 %v395_v4  ;;  %258 = vmatpush1.bf16.msra.mxu1 %v419_v13  ;;  %v407_v19 = vld [vmem:[%s576_s1 + $0xa0] ss:$16 sps:$4 sm:$0xff]   ;;  %v408_v20 = vld [vmem:[%s576_s1 + $0xc4] ss:$16 sps:$4 sm:$0xff]   ;;  %v426_v21 = vld [vmem:[%s576_s1 + $0x68] ss:$16 sps:$4 sm:$0xff]  }
   0x8   :  { %216 = vmatprep.subr.bf16.mxu0 %v396_v5  ;;  %259 = vmatprep.subr.bf16.mxu1 %v421_v15  ;;  %v427_v22 = vld [vmem:[%s576_s1 + $0x8c] ss:$16 sps:$4 sm:$0xff]   ;;  %v410_v23 = vld [vmem:[%s576_s1 + $0xc0] ss:$16 sps:$4 sm:$0xff]   ;;  %v414_v24 = vld [vmem:[%s576_s1 + $0xe4] ss:$16 sps:$4 sm:$0xff]  }
   0x9   :  { %v429_v25 = vld [vmem:[%s576_s1 + $0x88] ss:$16 sps:$4 sm:$0xff]   ;;  %v430_v26 = vld [vmem:[%s576_s1 + $0xac] ss:$16 sps:$4 sm:$0xff]   ;;  %v416_v27 = vld [vmem:[%s576_s1 + $0xe0] ss:$16 sps:$4 sm:$0xff]  }
   0xa   :  { %v432_v28 = vld [vmem:[%s576_s1 + $0xa8] ss:$16 sps:$4 sm:$0xff]   ;;  %v420_v29 = vld [vmem:[%s577_s0] sm:$0xff]   ;;  %v433_v30 = vld [vmem:[%s576_s1 + $0xcc] ss:$16 sps:$4 sm:$0xff]  }
   0xb   :  { %217 = vmatpush1.bf16.msra.mxu0 %v398_v6  ;;  %260 = vmatpush1.bf16.msra.mxu1 %v423_v17  ;;  %v435_v31 = vld [vmem:[%s576_s1 + $0xc8] ss:$16 sps:$4 sm:$0xff]   ;;  %v436_v32 = vld [vmem:[%s576_s1 + $0xec] ss:$16 sps:$4 sm:$0xff]  }
   0xc   :  { %218 = vmatprep.subr.bf16.mxu0 %v399_v7  ;;  %261 = vmatprep.subr.bf16.mxu1 %v424_v18  ;;  %v438_v33 = vld [vmem:[%s576_s1 + $0xe8] ss:$16 sps:$4 sm:$0xff]  }
   0xf   :  { %219 = vmatpush1.bf16.msra.mxu0 %v401_v10  ;;  %262 = vmatpush1.bf16.msra.mxu1 %v426_v21 }
  0x10   :  { %220 = vmatprep.subr.bf16.mxu0 %v402_v11  ;;  %263 = vmatprep.subr.bf16.mxu1 %v427_v22 }
  0x13   :  { %221 = vmatpush1.bf16.msra.mxu0 %v404_v14  ;;  %264 = vmatpush1.bf16.msra.mxu1 %v429_v25 }
  0x14   :  { %222 = vmatprep.subr.bf16.mxu0 %v405_v16  ;;  %265 = vmatprep.subr.bf16.mxu1 %v430_v26 }
  0x17   :  { %223 = vmatpush1.bf16.msra.mxu0 %v407_v19  ;;  %266 = vmatpush1.bf16.msra.mxu1 %v432_v28 }
  0x18   :  { %224 = vmatprep.subr.bf16.mxu0 %v408_v20  ;;  %267 = vmatprep.subr.bf16.mxu1 %v433_v30 }
  0x1b   :  { %225 = vmatpush1.bf16.msra.mxu0 %v410_v23  ;;  %268 = vmatpush1.bf16.msra.mxu1 %v435_v31 }
  0x1c   :  { %226 = vmatprep.subr.bf16.mxu0 %v414_v24  ;;  %269 = vmatprep.subr.bf16.mxu1 %v436_v32 }
  0x1f   :  { %227 = vmatpush1.bf16.msra.mxu0 %v416_v27  ;;  %270 = vmatpush1.bf16.msra.mxu1 %v438_v33 }
  0x22   :  { %245 = vmatmul.mubr.bf16.vlgmr.msra.gmra.mrb[0].mxu0 %v420_v29  ;;  %288 = vmatmul.mubr.bf16.vlgmr.msra.gmra.mrb[0].mxu1 %v420_v29 }
  0xf5   :  { %v246_v34 = vpop.f32.mrb[0].mxu0  ;;  %v289_v42 = vpop.f32.mrb[0].mxu1 }
  0xf6   :  { %v381_v35 = vmul.f32 -1.442695, %v246_v34  ;;  %v248_v36 = vpop.f32.mrb[1].mxu0  ;;  %v291_v43 = vpop.f32.mrb[1].mxu1 }
  0xf7   :  { %v382_v37 = vmul.f32 -1.442695, %v248_v36  ;;  %v250_v38 = vpop.f32.mrb[2].mxu0  ;;  %v293_v44 = vpop.f32.mrb[2].mxu1 }
  0xf8   :  { %439 = vpow2.f32 %v381_v35  ;;  %v383_v39 = vmul.f32 -1.442695, %v250_v38  ;;  %v252_v40 = vpop.f32.mrb[3].mxu0  ;;  %v295_v46 = vpop.f32.mrb[3].mxu1 }
  0xf9   :  { %441 = vpow2.f32 %v382_v37  ;;  %v384_v41 = vmul.f32 -1.442695, %v252_v40 }
  0xfa   :  { %443 = vpow2.f32 %v383_v39 }
  0xfb   :  { %445 = vpow2.f32 %v384_v41 }
 0x102   :  { %v440_v45 = vpop.eup %439 }
 0x103   :  { %v442_v47 = vpop.eup %441  ;;  %v310_v48 = vadd.f32 1.0, %v440_v45 }
 0x104   :  { %v444_v49 = vpop.eup %443  ;;  %v311_v50 = vadd.f32 1.0, %v442_v47 }
 0x105   :  { %v446_v51 = vpop.eup %445  ;;  %447 = vrcp.f32 %v310_v48  ;;  %v312_v52 = vadd.f32 1.0, %v444_v49 }
 0x106   :  { %449 = vrcp.f32 %v311_v50  ;;  %v313_v53 = vadd.f32 1.0, %v446_v51 }
 0x107   :  { %451 = vrcp.f32 %v312_v52 }
 0x108   :  { %453 = vrcp.f32 %v313_v53 }
 0x10f   :  { %v448_v54 = vpop.eup %447 }
 0x110   :  { %v450_v55 = vpop.eup %449  ;;  %v322_v56 = vmul.f32 %v448_v54, %v246_v34 }
 0x111   :  { %v452_v57 = vpop.eup %451  ;;  %v323_v58 = vmul.f32 %v450_v55, %v248_v36 }
 0x112   :  { %v454_v59 = vpop.eup %453  ;;  %v324_v60 = vmul.f32 %v452_v57, %v250_v38  ;;  %v326_v61 = vmul.f32 %v322_v56, %v289_v42 }
 0x113   :  { %v325_v62 = vmul.f32 %v454_v59, %v252_v40  ;;  %v327_v63 = vmul.f32 %v323_v58, %v291_v43 }
 0x114   :  { %v328_v0 = vmul.f32 %v324_v60, %v293_v44 }
 0x115   :  { %v387_v1 = vpack.c.bf16 %v327_v63, %v326_v61  ;;  %v329_v2 = vmul.f32 %v325_v62, %v295_v46 }
 0x117   :  { %342 = vst [vmem:[%s578_s2] sm:$0xff] %v387_v1  ;;  %v388_v3 = vpack.c.bf16 %v329_v2, %v328_v0 }
 0x119   :  { %343 = vst [vmem:[%s578_s2 + $0x8] sm:$0xff] %v388_v3 }

</bundles_post_ra>
